<compile_context>
chip_gen: v6e
topology: v6e:2x2x1
jax: 0.10.0
libtpu: 0.0.40
codegen_flags: <defaults>
</compile_context>

<pallas_src>
import jax
import jax.numpy as jnp
from jax.experimental import pallas as pl
from jax.experimental.pallas import tpu as pltpu


def _round_up(x, m):
    return ((x + m - 1) // m) * m


def _vmem_limit_bytes(frac=0.75, fallback=48 * 1024 * 1024):
    """75% of physical VMEM (96 MiB on v5e/v6e, 48 MiB on v7x); safe fallback."""
    try:
        info = pltpu.get_tpu_info()
        cap = getattr(info, "vmem_capacity_bytes", None)
        if cap:
            return int(frac * cap)
    except Exception:
        pass
    return fallback


# --------------------------------- kernels --------------------------------- #

def encode_kernel(x_ref, w1_ref, b1_ref, h_ref):
    # h = relu(x @ W1 + b1)    (feature dropout is identity in eval mode)
    h_ref[...] = jnp.maximum(
        jnp.dot(x_ref[...], w1_ref[...], preferred_element_type=jnp.float32)
        + b1_ref[...],
        0.0,
    )


def faconv_kernel(ar_ref, al_ref, dinv_ref, hn_ref, adj_ref, eraw_ref, out_ref):
    """One FAConv layer for one block of `bn` node rows.

    ar_ref   : (bn, 1)   f32  target scores  a_r . h_i   (this row block)
    al_ref   : (1, Np)   f32  source scores  a_l . h_j   (full graph, pre-transposed)
    dinv_ref : (bn, 1)   f32  deg^{-1/2}     (this row block)
    hn_ref   : (Np, Hp)  bf16 dinv * h       (full graph, resident)
    adj_ref  : (bn, Np)  int8 adjacency row block (exact 0/1)
    eraw_ref : (bn, Hp)  f32  eps * raw      (this row block)
    out_ref  : (bn, Hp)  f32  new hidden state
    """
    t = jnp.tanh(ar_ref[...] + al_ref[...])                         # (bn, Np) f32, EUP
    w = jnp.where(adj_ref[...] != 0, t, 0.0).astype(jnp.bfloat16)   # masked attention
    agg = jnp.dot(w, hn_ref[...], preferred_element_type=jnp.float32)  # (bn, Hp) f32 acc
    out_ref[...] = dinv_ref[...] * agg + eraw_ref[...]              # residual (eps folded)


def decode_kernel(h_ref, w2_ref, b2_ref, out_ref):
    # logits + log_softmax over classes (dim=1). Output is lane-sparse (C << 128) but
    # tiny; kept simple.
    logits = (jnp.dot(h_ref[...], w2_ref[...], preferred_element_type=jnp.float32)
              + b2_ref[...])
    m = jnp.max(logits, axis=1, keepdims=True)
    z = logits - m
    out_ref[...] = z - jnp.log(jnp.sum(jnp.exp(z), axis=1, keepdims=True))


# --------------------------------- wrapper --------------------------------- #

def fagcn_forward(x, adj, w1, b1, a_l, a_r, w2, b2, *, eps, num_layers, block_n=256):
    n, f = x.shape
    hdim = w1.shape[1]
    c = w2.shape[1]

    np_ = _round_up(n, block_n)       # pad node count to a multiple of the row block
    hp = _round_up(hdim, 128)         # pad hidden dim so matmul outputs are lane-dense
    nb = np_ // block_n

    # Zero-padding: padded adj rows/cols are 0 and padded hidden columns stay exactly 0,
    # so real outputs are unaffected; padded rows are sliced off at the end.
    xp = jnp.pad(x, ((0, np_ - n), (0, 0)))
    adjp = jnp.pad(adj, ((0, np_ - n), (0, np_ - n)))
    w1p = jnp.pad(w1, ((0, 0), (0, hp - hdim)))
    b1p = jnp.pad(b1, ((0, 0), (0, hp - hdim)))
    w2p = jnp.pad(w2, ((0, hp - hdim), (0, 0)))

    # Per-layer fused attention operand: column 0 = a_r (target), column 1 = a_l (source).
    a2 = [jnp.pad(jnp.stack([a_r[:, l], a_l[:, l]], axis=1), ((0, hp - hdim), (0, 0)))
          for l in range(num_layers)]

    # Symmetric degree normalization precomputed in plain XLA (self loops included).
    deg = jnp.sum(adjp, axis=1, keepdims=True)
    dinv = jnp.where(deg > 0, jax.lax.rsqrt(deg), 0.0).astype(jnp.float32)

    adj_i8 = adjp.astype(jnp.int8)    # 0/1 exact; halves HBM traffic vs bf16, 4x vs f32

    cparams = pltpu.CompilerParams(
        dimension_semantics=("parallel",),          # row blocks shard across TCs (v7x)
        vmem_limit_bytes=_vmem_limit_bytes(),       # 75% of physical VMEM
    )

    # ---- encoder: h = relu(x @ W1 + b1) ----
    h = pl.pallas_call(
        encode_kernel,
        out_shape=jax.ShapeDtypeStruct((np_, hp), jnp.float32),
        grid=(nb,),
        in_specs=[
            pl.BlockSpec((block_n, f), lambda i: (i, 0)),
            pl.BlockSpec((f, hp), lambda i: (0, 0)),
            pl.BlockSpec((1, hp), lambda i: (0, 0)),
        ],
        out_specs=pl.BlockSpec((block_n, hp), lambda i: (i, 0)),
        compiler_params=cparams,
    )(xp, w1p, b1p)

    eraw = eps * h   # eps*raw hoisted out of the layer loop (tiny XLA elementwise)

    # ---- FAConv layers (row-blocked propagation) ----
    layer_call = pl.pallas_call(
        faconv_kernel,
        out_shape=jax.ShapeDtypeStruct((np_, hp), jnp.float32),
        grid=(nb,),
        in_specs=[
            pl.BlockSpec((block_n, 1), lambda i: (i, 0)),     # ar     (row block)
            pl.BlockSpec((1, np_), lambda i: (0, 0)),         # al^T   (full, resident)
            pl.BlockSpec((block_n, 1), lambda i: (i, 0)),     # dinv   (row block)
            pl.BlockSpec((np_, hp), lambda i: (0, 0)),        # hn bf16 (full, resident)
            pl.BlockSpec((block_n, np_), lambda i: (i, 0)),   # adj int8 (row block, streamed)
            pl.BlockSpec((block_n, hp), lambda i: (i, 0)),    # eps*raw (row block)
        ],
        out_specs=pl.BlockSpec((block_n, hp), lambda i: (i, 0)),
        compiler_params=cparams,
    )

    for l in range(num_layers):
        # Hoisted per-layer whole-graph quantities (tiny XLA ops, not per-row-block):
        s = jnp.dot(h, a2[l], preferred_element_type=jnp.float32)   # (Np, 2)
        ar = s[:, 0:1]                                              # (Np, 1) target scores
        al_t = jnp.transpose(s[:, 1:2])                             # (1, Np) source scores
        hn = (dinv * h).astype(jnp.bfloat16)                        # (Np, Hp) normalized h
        h = layer_call(ar, al_t, dinv, hn, adj_i8, eraw)

    # ---- decoder: log_softmax(h @ W2 + b2, axis=1) ----
    out = pl.pallas_call(
        decode_kernel,
        out_shape=jax.ShapeDtypeStruct((np_, c), jnp.float32),
        grid=(nb,),
        in_specs=[
            pl.BlockSpec((block_n, hp), lambda i: (i, 0)),
            pl.BlockSpec((hp, c), lambda i: (0, 0)),
            pl.BlockSpec((1, c), lambda i: (0, 0)),
        ],
        out_specs=pl.BlockSpec((block_n, c), lambda i: (i, 0)),
        compiler_params=cparams,
    )(h, w2p, b2)

    return out[:n]


# -------------------------------- references ------------------------------- #

def fagcn_reference(x, adj, w1, b1, a_l, a_r, w2, b2, *, eps, num_layers):
    """Pure f32 reference matching the PyTorch module (eval mode)."""
    h = jnp.maximum(x @ w1 + b1, 0.0)
    raw = h
    deg = jnp.sum(adj, axis=1, keepdims=True)
    dinv = jnp.where(deg > 0, 1.0 / jnp.sqrt(deg), 0.0)
    for l in range(num_layers):
        ar = h @ a_r[:, l:l + 1]
        al = h @ a_l[:, l:l + 1]
        t = jnp.tanh(ar + al.T)
        w = adj * t * dinv * dinv.T
        h = w @ h + eps * raw
    logits = h @ w2 + b2
    return jax.nn.log_softmax(logits, axis=1)


def fagcn_reference_bf16(x, adj, w1, b1, a_l, a_r, w2, b2, *, eps, num_layers):
    """Reference replicating the kernel's bf16 propagation matmul (f32 accumulation)."""
    h = jnp.maximum(x @ w1 + b1, 0.0)
    raw = h
    deg = jnp.sum(adj, axis=1, keepdims=True)
    dinv = jnp.where(deg > 0, jax.lax.rsqrt(deg), 0.0)
    for l in range(num_layers):
        ar = h @ a_r[:, l:l + 1]
        al = h @ a_l[:, l:l + 1]
        t = jnp.tanh(ar + al.T)
        w = jnp.where(adj != 0, t, 0.0).astype(jnp.bfloat16)
        hn = (dinv * h).astype(jnp.bfloat16)
        h = dinv * jnp.dot(w, hn, preferred_element_type=jnp.float32) + eps * raw
    logits = h @ w2 + b2
    return jax.nn.log_softmax(logits, axis=1)


def xavier_normal(key, fan_in, fan_out, gain):
    std = gain * (2.0 / (fan_in + fan_out)) ** 0.5
    return std * jax.random.normal(key, (fan_in, fan_out), dtype=jnp.float32)


if __name__ == "__main__":
    # Small synthetic problem: num_feat=32, hidden_dimension=64, num_class=8,
    # num_layers=2, eps=0.3; dropout ignored (eval mode).
    N, F, H, C, L = 256, 32, 64, 8, 2
    EPS = 0.3
    E = 1024

    key = jax.random.PRNGKey(0)
    kx, ke1, ke2, kw1, kb1, kal, kar, kw2, kb2 = jax.random.split(key, 9)

    # node features
    x = jax.random.normal(kx, (N, F), dtype=jnp.float32)

    # random undirected edge_index -> dense adjacency with self loops
    src = jax.random.randint(ke1, (E,), 0, N)
    dst = jax.random.randint(ke2, (E,), 0, N)
    adj = jnp.zeros((N, N), dtype=jnp.float32).at[dst, src].set(1.0)
    adj = jnp.maximum(adj, adj.T)                        # undirected
    adj = adj.at[jnp.arange(N), jnp.arange(N)].set(1.0)  # self loops (gcn_norm)

    # parameters (xavier_normal gain=1.414 for t1/t2, matching reset_parameters)
    w1 = xavier_normal(kw1, F, H, 1.414)
    b1 = 0.01 * jax.random.normal(kb1, (1, H), dtype=jnp.float32)
    a_l = xavier_normal(kal, H, L, 1.0)   # per-layer source attention vectors (col l)
    a_r = xavier_normal(kar, H, L, 1.0)   # per-layer target attention vectors (col l)
    w2 = xavier_normal(kw2, H, C, 1.414)
    b2 = 0.01 * jax.random.normal(kb2, (1, C), dtype=jnp.float32)

    # block_n=128 here so the small test exercises a multi-step grid; default is 256.
    out = fagcn_forward(x, adj, w1, b1, a_l, a_r, w2, b2,
                        eps=EPS, num_layers=L, block_n=128)
    out = jax.block_until_ready(out)
    assert out.shape == (N, C)
    assert not bool(jnp.any(jnp.isnan(out)))

    # tight check vs a reference using identical bf16-propagation numerics
    ref_bf16 = fagcn_reference_bf16(x, adj, w1, b1, a_l, a_r, w2, b2, eps=EPS, num_layers=L)
    assert jnp.allclose(out, ref_bf16, rtol=5e-3, atol=5e-3), "mismatch vs bf16 reference"

    # looser sanity check vs the exact f32 reference (tolerance widened only for the
    # bf16 propagation matmul; all other math is f32)
    ref_f32 = fagcn_reference(x, adj, w1, b1, a_l, a_r, w2, b2, eps=EPS, num_layers=L)
    assert jnp.allclose(out, ref_f32, rtol=5e-2, atol=5e-2), "mismatch vs f32 reference"

    print("KERNEL_OK")
</pallas_src>

<mosaic_0001>
module attributes {stable_mosaic.version = 11 : i64} {
  func.func @encode_kernel(%arg0: i32, %arg1: memref<128x32xf32, #tpu.memory_space<vmem>>, %arg2: memref<32x128xf32, #tpu.memory_space<vmem>>, %arg3: memref<1x128xf32, #tpu.memory_space<vmem>>, %arg4: memref<128x128xf32, #tpu.memory_space<vmem>>) attributes {dimension_semantics = [#tpu.dimension_semantics<parallel>], iteration_bounds = array<i64: 2>, scalar_prefetch = 0 : i64, scratch_operands = 0 : i64, tpu.core_type = #tpu.core_type<tc>, window_params = [{transform_indices = @transform_0, window_bounds = array<i64: 128, 32>}, {pipeline_mode = #tpu.pipeline_mode<synchronous>, transform_indices = @transform_1, window_bounds = array<i64: 32, 128>}, {pipeline_mode = #tpu.pipeline_mode<synchronous>, transform_indices = @transform_2, window_bounds = array<i64: 1, 128>}, {transform_indices = @transform_3, window_bounds = array<i64: 128, 128>}]} {
    %c0 = arith.constant 0 : index
    %c0_0 = arith.constant 0 : index
    %0 = vector.load %arg1[%c0, %c0_0] : memref<128x32xf32, #tpu.memory_space<vmem>>, vector<128x32xf32>
    %c0_1 = arith.constant 0 : index
    %c0_2 = arith.constant 0 : index
    %1 = vector.load %arg2[%c0_1, %c0_2] : memref<32x128xf32, #tpu.memory_space<vmem>>, vector<32x128xf32>
    %cst = arith.constant dense<0.000000e+00> : vector<128x128xf32>
    %2 = tpu.matmul %0, %1, %cst {dimension_numbers = #tpu.dot_dimension_numbers<[1], [0], [0], [1], [0, 0, 1, 1], [], []>} : vector<128x32xf32>, vector<32x128xf32>, vector<128x128xf32> -> vector<128x128xf32>
    %c0_3 = arith.constant 0 : index
    %c0_4 = arith.constant 0 : index
    %3 = vector.load %arg3[%c0_3, %c0_4] : memref<1x128xf32, #tpu.memory_space<vmem>>, vector<1x128xf32>
    %4 = vector.broadcast %3 : vector<1x128xf32> to vector<128x128xf32>
    %5 = arith.addf %2, %4 : vector<128x128xf32>
    %cst_5 = arith.constant 0.000000e+00 : f32
    %6 = vector.broadcast %cst_5 : f32 to vector<128x128xf32>
    %7 = arith.maximumf %5, %6 : vector<128x128xf32>
    %c0_6 = arith.constant 0 : index
    %c0_7 = arith.constant 0 : index
    %8 = vector.load %arg4[%c0_6, %c0_7] : memref<128x128xf32, #tpu.memory_space<vmem>>, vector<128x128xf32>
    tpu.vector_store %arg4[%c0_6, %c0_7], %7 {strides = array<i32>} : memref<128x128xf32, #tpu.memory_space<vmem>>, vector<128x128xf32>,
    return
  }
  func.func @transform_0(%arg0: i32) -> (i32, i32) {
    %c0_i32 = arith.constant 0 : i32
    %c0_i32_0 = arith.constant 0 : i32
    return %arg0, %c0_i32 : i32, i32
  }
  func.func @transform_1(%arg0: i32) -> (i32, i32) {
    %c0_i32 = arith.constant 0 : i32
    %c0_i32_0 = arith.constant 0 : i32
    %c0_i32_1 = arith.constant 0 : i32
    return %c0_i32, %c0_i32_0 : i32, i32
  }
  func.func @transform_2(%arg0: i32) -> (i32, i32) {
    %c0_i32 = arith.constant 0 : i32
    %c0_i32_0 = arith.constant 0 : i32
    %c0_i32_1 = arith.constant 0 : i32
    return %c0_i32, %c0_i32_0 : i32, i32
  }
  func.func @transform_3(%arg0: i32) -> (i32, i32) {
    %c0_i32 = arith.constant 0 : i32
    %c0_i32_0 = arith.constant 0 : i32
    return %arg0, %c0_i32 : i32, i32
  }
}

</mosaic_0001>

<bundles_post_ra>
// kernel: tpu_custom_call.1
= control target key start
LH: loop header
LB: loop body
LE: loop exit
PB: predicated region body
PF: predicated region fallthrough
CT: control target
= control target key end

     0   :  { %8 = vsyncpa [#allocation3], 0  ;;  %s890_s0 = inlined_call_operand.vmem [shape: f32[256,32], index: 0, kind: input, shape index: {}]   ;;  %s891_s1 = inlined_call_operand.vmem [shape: f32[32,128], index: 1, kind: input, shape index: {}]   ;;  %s892_s2 = inlined_call_operand.vmem [shape: f32[1,128], index: 2, kind: input, shape index: {}]   ;;  %s893_s3 = inlined_call_operand.hbm [shape: f32[256,128], index: 3, kind: output, shape index: {}]  }
   0x1   :  { %10 = vsyncpa [#allocation3 + $0x1], 0  ;;  %s717_s12 = smov 0   ;;  %s719_s13 = smov 0  }
   0x2   :  { %s721_s14 = smov 0   ;;  %s723_s15 = smov 0  }
   0x3 LB: > { %s738_s16 = sadd.s32 4294967295, %s692_s15   ;;  %s501_s17 = sadd.s32 4294967294, %s692_s15   ;;  %s692_s15 = sphi %s723_s15, %s899_s15   ;;  %s688_s14 = sphi %s721_s14, %s898_s14   ;;  %s684_s13 = sphi %s719_s13, %s897_s13   ;;  %s680_s12 = sphi %s717_s12, %s896_s12  }
   0x4   : > { %s742_s18 = sadd.s32 1, %s692_s15   ;;  %s91_s19 = sadd.s32 1, %s688_s14 }
   0x5   : > { %s88_s20 = ssub.s32 %s692_s15, %s742_s18  ;;  %p101_p0 = scmp.ne.s32.totalorder %s688_s14, %s684_s13 }
   0x6   : > { %p89_p1 = scmp.eq.s32.totalorder %s88_s20, 0  ;;  %p102_p2 = scmp.eq.s32.totalorder %s738_s16, 1 }
   0x7   : > { %p107_p3 = scmp.ne.s32.totalorder %s684_s13, %s680_s12  ;;  %p108_p4 = scmp.eq.s32.totalorder %s501_s17, 1 }
   0x8   : > { %s753_s21 = scalar_select %p89_p1, %s688_s14, %s91_s19  }
   0x9   : > { %p755_p5 = por %p102_p2, %p101_p0  ;;  %p759_p6 = por %p108_p4, %p107_p3 }
   0xa   : > { %p504_p7 = scmp.ge.s32.totalorder %s692_s15, 1  ;;  %p141_p8 = scmp.lt.s32.totalorder %s692_s15, 3 }
   0xc   : > { %p142_p9 = pnand %p504_p7, %p141_p8 }
   0xd   : > { %s506_s28 = sshll.u32 (!%p142_p9), %s738_s16, 4  ;;  %s162_s10 = sand.u32 (!%p142_p9), 1, %s684_s13  }
   0xe   : > { %145 = sbr.rel (%p142_p9) target bundleno = 254 (0xfe), region = 32  ;;  %p166_p10 = scmp.lt.s32.totalorder (!%p142_p9), %s506_s28, 31 }
   0xf   : > { %s505_s19 = sshll.u32 (!%p142_p9), %s162_s10, 7  ;;  %s530_s24 = sshll.u32 (!%p142_p9), %s738_s16, 11 }
  0x10   : > { %s821_s20 = scalar_lea.vmem (!%p142_p9), [#allocation2], %s505_s19  ;;  %s850_s16 = scalar_lea.sflag (!%p142_p9), [#allocation3], %s162_s10 }
  0x11   : > { %s439_s25 = sshll.u32 (!%p142_p9), %s821_s20, 4  ;;  %s694_s30 = smov (!%p142_p9), [#allocation2]   ;;  %s842_s25 = int_to_ptr.vmem [resolvable:$true] %s439_s25 }
  0x12   : > { %s632_s29 = scalar_lea.vmem (!%p142_p9), %s842_s25, 2048  ;;  %s636_s4 = sshll.u32 (!%p142_p9), %s694_s30, 4  ;;  %s637_s4 = int_to_ptr.vmem [resolvable:$false] %s636_s4 }
  0x13   : > { %v191_v0 = vld [vmem:[%s891_s1 + $0x18] sm:$0xff]  ;;  %v190_v1 = vld [vmem:[%s891_s1 + $0x10] sm:$0xff]  ;;  %v189_v2 = vld [vmem:[%s891_s1 + $0x8] sm:$0xff]  ;;  %s901_s28 = smov (!%p166_p10, %s506_s28), 31  ;;  %vm199_vm0 = vcmask 261120   ;;  %p633_p11 = scmp.ne.s32.totalorder %s842_s25, %s632_s29 }
  0x14   : > { %551 = vmatprep.subr.mxu0 %v191_v0  ;;  %583 = vmatprep.subr.mxu1 %v191_v0  ;;  %v188_v3 = vld [vmem:[%s891_s1] sm:$0xff]  ;;  %s507_s6 = sshll.u32 %s901_s28, 3  ;;  %s840_s28 = scalar_lea.hbm %s893_s3, %s530_s24 }
  0x15   : > { %552 = vmatpush3.msra.mxu0 %v191_v0  ;;  %587 = vmatpush3.msra.mxu1 %v191_v0  ;;  %s781_s9 = scalar_lea.vmem %s890_s0, %s507_s6  ;;  %v508_v20 = vld [vmem:[%s892_s2] ss:$0 sm:$0xff]  ;;  %p634_p12 = pnand %p633_p11, %p755_p5 }
  0x16   : > { %553 = vmatprep.subr.mxu0 %v190_v1  ;;  %584 = vmatprep.subr.mxu1 %v190_v1  ;;  %v172_v4 = vld [vmem:[%s781_s9] sm:$0xff]  ;;  %v173_v6 = vld [vmem:[%s781_s9 + $0x8] sm:$0xff]  ;;  %v174_v8 = vld [vmem:[%s781_s9 + $0x10] sm:$0xff]  ;;  %s638_s5 = scalar_lea.vmem %s637_s4, 4096  ;;  %p639_p0 = scmp.lt.s32.totalorder %s842_s25, %s637_s4 }
  0x17   : > { %554 = vmatpush3.msra.mxu0 %v190_v1  ;;  %588 = vmatpush3.msra.mxu1 %v190_v1  ;;  %v180_v5 = vld [vmem:[%s781_s9 + $0x40] sm:$0xff]  ;;  %v181_v7 = vld [vmem:[%s781_s9 + $0x48] sm:$0xff]  ;;  %v182_v9 = vld [vmem:[%s781_s9 + $0x50] sm:$0xff]  ;;  %p635_p13 = pneg %p634_p12  ;;  %p640_p1 = scmp.lt.s32.totalorder %s638_s5, %s632_s29 }
  0x18   : > { %555 = vmatprep.subr.mxu0 %v189_v2  ;;  %585 = vmatprep.subr.mxu1 %v189_v2  ;;  %v175_v10 = vld [vmem:[%s781_s9 + $0x18] sm:$0xff]  ;;  %v176_v12 = vld [vmem:[%s781_s9 + $0x20] sm:$0xff]  ;;  %v177_v14 = vld [vmem:[%s781_s9 + $0x28] sm:$0xff] }
  0x19   : > { %556 = vmatpush3.msra.mxu0 %v189_v2  ;;  %589 = vmatpush3.msra.mxu1 %v189_v2  ;;  %v183_v11 = vld [vmem:[%s781_s9 + $0x58] sm:$0xff]  ;;  %v184_v13 = vld [vmem:[%s781_s9 + $0x60] sm:$0xff]  ;;  %v185_v15 = vld [vmem:[%s781_s9 + $0x68] sm:$0xff]  ;;  %p641_p2 = por %p640_p1, %p639_p0 }
  0x1a   : > { %557 = vmatprep.subr.mxu0 %v188_v3  ;;  %586 = vmatprep.subr.mxu1 %v188_v3  ;;  %v178_v16 = vld [vmem:[%s781_s9 + $0x30] sm:$0xff]  ;;  %v179_v18 = vld [vmem:[%s781_s9 + $0x38] sm:$0xff] }
  0x1b   : > { %558 = vmatpush3.msra.mxu0 %v188_v3  ;;  %590 = vmatpush3.msra.mxu1 %v188_v3  ;;  %v186_v17 = vld [vmem:[%s781_s9 + $0x70] sm:$0xff]  ;;  %v187_v19 = vld [vmem:[%s781_s9 + $0x78] sm:$0xff]  ;;  %p642_p3 = pnand %p641_p2, %p635_p13 }
  0x1c   : > { %559 = vmatprep.mubr.msk.f32.mxu0 %vm199_vm0, %v172_v4  ;;  %571 = vmatprep.mubr.msk.f32.mxu1 %vm199_vm0, %v180_v5 }
  0x1d   : > { %560 = vmatmul.mubr.msk.f32.vlgmr.msra.gmra.mxu0 %vm199_vm0, %v173_v6  ;;  %572 = vmatmul.mubr.msk.f32.vlgmr.msra.gmra.mxu1 %vm199_vm0, %v181_v7 }
  0x1e   : > { %562 = vmatprep.mubr.msk.f32.mxu0 %vm199_vm0, %v174_v8  ;;  %574 = vmatprep.mubr.msk.f32.mxu1 %vm199_vm0, %v182_v9 }
  0x21   : > { %563 = vmatmul.mubr.msk.f32.gmra.mxu0 %vm199_vm0, %v175_v10  ;;  %575 = vmatmul.mubr.msk.f32.gmra.mxu1 %vm199_vm0, %v183_v11 }
  0x22   : > { %565 = vmatprep.mubr.msk.f32.mxu0 %vm199_vm0, %v176_v12  ;;  %577 = vmatprep.mubr.msk.f32.mxu1 %vm199_vm0, %v184_v13 }
  0x25   : > { %566 = vmatmul.mubr.msk.f32.gmra.mxu0 %vm199_vm0, %v177_v14  ;;  %578 = vmatmul.mubr.msk.f32.gmra.mxu1 %vm199_vm0, %v185_v15 }
  0x26   : > { %568 = vmatprep.mubr.msk.f32.mxu0 %vm199_vm0, %v178_v16  ;;  %580 = vmatprep.mubr.msk.f32.mxu1 %vm199_vm0, %v186_v17 }
  0x29   : > { %569 = vmatmul.mubr.msk.f32.gmra.mxu0 %vm199_vm0, %v179_v18  ;;  %581 = vmatmul.mubr.msk.f32.gmra.mxu1 %vm199_vm0, %v187_v19 }
  0xdd   : > { %v561_v21 = vpop.f32.mrf.mxu0  ;;  %v573_v22 = vpop.f32.mrf.mxu1 }
  0xde   : > { %v320_v23 = vadd.f32 %v561_v21, %v508_v20  ;;  %v360_v24 = vadd.f32 %v573_v22, %v508_v20 }
  0xdf   : > { %v314_v25 = vpop.f32.mrf.mxu0  ;;  %v354_v26 = vpop.f32.mrf.mxu1 }
  0xe0   : > { %v394_v27 = vmax.f32 %v320_v23, 0.0  ;;  %v402_v28 = vmax.f32 %v360_v24, 0.0  ;;  %v315_v29 = vadd.f32 %v508_v20, %v314_v25  ;;  %v355_v30 = vadd.f32 %v508_v20, %v354_v26 }
  0xe1   : > { %v564_v31 = vpop.f32.mrf.mxu0  ;;  %v576_v32 = vpop.f32.mrf.mxu1 }
  0xe2   : > { %410 = vst [vmem:[%s821_s20 + $0x8] sm:$0xff] %v394_v27  ;;  %418 = vst [vmem:[%s821_s20 + $0x48] sm:$0xff] %v402_v28  ;;  %v393_v33 = vmax.f32 %v315_v29, 0.0  ;;  %v401_v34 = vmax.f32 %v355_v30, 0.0  ;;  %v330_v35 = vadd.f32 %v564_v31, %v508_v20  ;;  %v370_v36 = vadd.f32 %v576_v32, %v508_v20 }
  0xe3   : > { %v324_v37 = vpop.f32.mrf.mxu0  ;;  %v364_v38 = vpop.f32.mrf.mxu1 }
  0xe4   : > { %409 = vst [vmem:[%s821_s20] sm:$0xff] %v393_v33  ;;  %417 = vst [vmem:[%s821_s20 + $0x40] sm:$0xff] %v401_v34  ;;  %v396_v39 = vmax.f32 %v330_v35, 0.0  ;;  %v404_v40 = vmax.f32 %v370_v36, 0.0  ;;  %v325_v41 = vadd.f32 %v508_v20, %v324_v37  ;;  %v365_v42 = vadd.f32 %v508_v20, %v364_v38 }
  0xe5   : > { %v567_v43 = vpop.f32.mrf.mxu0  ;;  %v579_v44 = vpop.f32.mrf.mxu1 }
  0xe6   : > { %412 = vst [vmem:[%s821_s20 + $0x18] sm:$0xff] %v396_v39  ;;  %420 = vst [vmem:[%s821_s20 + $0x58] sm:$0xff] %v404_v40  ;;  %v395_v45 = vmax.f32 %v325_v41, 0.0  ;;  %v403_v46 = vmax.f32 %v365_v42, 0.0  ;;  %v340_v47 = vadd.f32 %v567_v43, %v508_v20  ;;  %v380_v48 = vadd.f32 %v579_v44, %v508_v20 }
  0xe7   : > { %v334_v49 = vpop.f32.mrf.mxu0  ;;  %v374_v50 = vpop.f32.mrf.mxu1 }
  0xe8   : > { %411 = vst [vmem:[%s821_s20 + $0x10] sm:$0xff] %v395_v45  ;;  %419 = vst [vmem:[%s821_s20 + $0x50] sm:$0xff] %v403_v46  ;;  %v398_v51 = vmax.f32 %v340_v47, 0.0  ;;  %v406_v52 = vmax.f32 %v380_v48, 0.0  ;;  %v335_v53 = vadd.f32 %v508_v20, %v334_v49  ;;  %v375_v54 = vadd.f32 %v508_v20, %v374_v50 }
  0xe9   : > { %v570_v55 = vpop.f32.mrf.mxu0  ;;  %v582_v56 = vpop.f32.mrf.mxu1 }
  0xea   : > { %414 = vst [vmem:[%s821_s20 + $0x28] sm:$0xff] %v398_v51  ;;  %422 = vst [vmem:[%s821_s20 + $0x68] sm:$0xff] %v406_v52  ;;  %v397_v57 = vmax.f32 %v335_v53, 0.0  ;;  %v405_v58 = vmax.f32 %v375_v54, 0.0  ;;  %v350_v59 = vadd.f32 %v570_v55, %v508_v20  ;;  %v390_v60 = vadd.f32 %v582_v56, %v508_v20 }
  0xeb   : > { %v344_v61 = vpop.f32.mrf.mxu0  ;;  %v384_v62 = vpop.f32.mrf.mxu1 }
  0xec   : > { %413 = vst [vmem:[%s821_s20 + $0x20] sm:$0xff] %v397_v57  ;;  %421 = vst [vmem:[%s821_s20 + $0x60] sm:$0xff] %v405_v58  ;;  %v400_v63 = vmax.f32 %v350_v59, 0.0  ;;  %v408_v0 = vmax.f32 %v390_v60, 0.0  ;;  %v345_v1 = vadd.f32 %v508_v20, %v344_v61  ;;  %v385_v2 = vadd.f32 %v508_v20, %v384_v62 }
  0xee   : > { %416 = vst [vmem:[%s821_s20 + $0x38] sm:$0xff] %v400_v63  ;;  %424 = vst [vmem:[%s821_s20 + $0x78] sm:$0xff] %v408_v0  ;;  %v399_v3 = vmax.f32 %v345_v1, 0.0  ;;  %v407_v4 = vmax.f32 %v385_v2, 0.0 }
  0xf0   : > { %415 = vst [vmem:[%s821_s20 + $0x30] sm:$0xff] %v399_v3  ;;  %423 = vst [vmem:[%s821_s20 + $0x70] sm:$0xff] %v407_v4 }
  0xf1   : > { %645 = shalt.err (!%p642_p3)
}
  0xf2   : > { %s646_s6 = scalar_lea.hbm %s840_s28, 2048  ;;  %s650_s9 = scalar_lea.hbm %s893_s3, 4096 }
  0xf3   : > { %p647_p4 = scmp.ne.s32.totalorder %s840_s28, %s646_s6  ;;  %p651_p9 = scmp.lt.s32.totalorder %s840_s28, %s893_s3 }
  0xf4   : > { %p652_p10 = scmp.lt.s32.totalorder %s650_s9, %s646_s6 }
  0xf5   : > { %p648_p7 = pnand %p647_p4, %p755_p5 }
  0xf6   : > { %p653_p11 = por %p652_p10, %p651_p9 }
  0xf7   : > { %p649_p8 = pneg %p648_p7 }
  0xf9   : > { %p654_p12 = pnand %p653_p11, %p649_p8 }
  0xfb   : > { %657 = shalt.err (!%p654_p12)
}
  0xfc   : > { %s695_s17 = smov 128   ;;  %s696_s19 = smov 8  }
  0xfd   : > { %591 = dma.vmem_to_hbm [thread:$0]  (%p755_p5), %s842_s25, 2048, %s840_s28, %s850_s16, %s695_s17, %s695_s17, %s696_s19  }
  0xfe PF: > { %p597_p13 = scmp.ge.s32.totalorder %s692_s15, 2  ;;  %s454_s20 = sand.u32 1, %s680_s12  }
  0xff   : > { %s455_s24 = scalar_lea.sflag [#allocation3], %s454_s20 }
 0x100   : > { %p594_p0 = pnand %p597_p13, %p759_p6 }
 0x102   : > { %p595_p1 = pneg %p594_p0 }
 0x104   : > { %675 = dma.done.wait (%p595_p1), %s455_s24, 2048  }
 0x105   : > { %677 = vsyncadd (%p595_p1), %s455_s24, 4294965248  ;;  %p13_p2 = scmp.ge.s32.totalorder %s742_s18, 4   ;;  %s896_s12 = smov %s684_s13 }
 0x106   : > { %s897_s13 = smov %s688_s14  ;;  %s898_s14 = smov %s753_s21 }
 0x107   : > { %s899_s15 = smov %s742_s18  ;;  %15 = sbr.rel (!%p13_p2) target bundleno = 3 (0x3), region = 67 }
 0x10c   :  { %460 = vsyncpa [#allocation3], 1 }
 0x10d   :  { %462 = vsyncpa [#allocation3 + $0x1], 1 }

</bundles_post_ra>
